<compile_context>
chip_gen: v7x
topology: tpu7x:2x2x1
jax: 0.10.0
libtpu: 0.0.40
codegen_flags: <defaults>
</compile_context>

<pallas_src>
import jax
import jax.numpy as jnp
from jax.experimental import pallas as pl
from jax.experimental.pallas import tpu as pltpu


def _fused_conv_kernel(wf_ref, bf_ref, x_ref, o_ref):
    # wf_ref: SMEM (3, 3) fused weight (out_c, in_c)
    # bf_ref: SMEM (3,)   fused bias
    # x_ref / o_ref: VMEM (1, 3, W_TILE), W on the lane axis (lane-dense)
    x0 = x_ref[:, 0, :]  # (1, W_TILE)
    x1 = x_ref[:, 1, :]
    x2 = x_ref[:, 2, :]
    for c in range(3):  # unrolled: one VPU broadcast-FMA chain per output channel
        o_ref[:, c, :] = (wf_ref[c, 0] * x0
                          + wf_ref[c, 1] * x1
                          + wf_ref[c, 2] * x2
                          + bf_ref[c])


def _pick_w_tile(W):
    # Largest lane-aligned tile that divides W (fallback: full W when W % 128 != 0,
    # which satisfies the "block equals full array dim" rule).
    if W % 128 != 0:
        return W
    for cand in (4096, 2048, 1024, 512, 256, 128):
        if W % cand == 0:
            return cand
    return W


def transformation_forward(data, w1, b1, w2, b2):
    """Exact forward of the PyTorch module.

    data: (N, 3, 1, W) float32 (NCHW, H must be 1)
    w1:   (9, 3, 1, 1), b1: (9,)   -- conv1 params (PyTorch layout)
    w2:   (3, 9, 1, 1), b2: (3,)   -- conv2 params (PyTorch layout)
    returns: (N, 3 * W) float32
    """
    N, C, H, W = data.shape
    assert C == 3 and H == 1, "Transformation requires 3 input channels and H == 1"

    # Free reshape (H == 1): native channels-on-sublane / W-on-lane slab.
    x = data.reshape(N, C, W)

    # Fuse the two 1x1 convs into a single 3x3 affine map.
    w1m = w1.reshape(9, 3).astype(jnp.float32)
    w2m = w2.reshape(3, 9).astype(jnp.float32)
    wf = w2m @ w1m                                              # (3, 3)
    bf = w2m @ b1.astype(jnp.float32) + b2.astype(jnp.float32)  # (3,)

    wt = _pick_w_tile(W)
    grid = (N, W // wt)

    y = pl.pallas_call(
        _fused_conv_kernel,
        out_shape=jax.ShapeDtypeStruct((N, 3, W), data.dtype),
        grid=grid,
        in_specs=[
            pl.BlockSpec(memory_space=pltpu.MemorySpace.SMEM),   # wf (3,3)
            pl.BlockSpec(memory_space=pltpu.MemorySpace.SMEM),   # bf (3,)
            pl.BlockSpec((1, 3, wt), lambda n, w: (n, 0, w)),    # x tile
        ],
        out_specs=pl.BlockSpec((1, 3, wt), lambda n, w: (n, 0, w)),
        compiler_params=pltpu.CompilerParams(
            dimension_semantics=("parallel", "parallel")),
    )(wf, bf, x)

    # Per-pixel channel interleave, identical to squeeze().transpose(2,1).reshape(N, 3*W).
    return jnp.transpose(y, (0, 2, 1)).reshape(N, 3 * W)


def _reference_forward(data, w1, b1, w2, b2):
    # Pure-JAX reference of the PyTorch semantics (two sequential 1x1 convs in NCHW).
    N, C, H, W = data.shape
    w1m = w1.reshape(9, 3)
    w2m = w2.reshape(3, 9)
    y1 = jnp.einsum("oc,nchw->nohw", w1m, data) + b1[None, :, None, None]
    y2 = jnp.einsum("oc,nchw->nohw", w2m, y1) + b2[None, :, None, None]
    sq = jnp.squeeze(y2)                 # (N, 3, W)  since H == 1
    tr = jnp.transpose(sq, (0, 2, 1))    # (N, W, 3)
    return tr.reshape(N, 3 * W)


if __name__ == "__main__":
    key = jax.random.PRNGKey(0)
    k_data, k_w1, k_b1, k_w2, k_b2 = jax.random.split(key, 5)

    # Deterministic synthetic parameters (PyTorch Conv2d weight/bias shapes).
    w1 = jax.random.normal(k_w1, (9, 3, 1, 1), dtype=jnp.float32) * 0.5
    b1 = jax.random.normal(k_b1, (9,), dtype=jnp.float32) * 0.1
    w2 = jax.random.normal(k_w2, (3, 9, 1, 1), dtype=jnp.float32) * 0.5
    b2 = jax.random.normal(k_b2, (3,), dtype=jnp.float32) * 0.1

    # Small module-consistent shapes; second case exercises the W-tiled grid path.
    for (N, W) in [(2, 16), (2, 384)]:
        data = jax.random.normal(jax.random.fold_in(k_data, W),
                                 (N, 3, 1, W), dtype=jnp.float32)
        out = jax.block_until_ready(transformation_forward(data, w1, b1, w2, b2))
        ref = _reference_forward(data, w1, b1, w2, b2)
        assert out.shape == (N, 3 * W), out.shape
        assert jnp.allclose(out, ref, atol=1e-5, rtol=1e-5), "mismatch vs reference"

    print("KERNEL_OK")
</pallas_src>

<mosaic_0001>
module attributes {stable_mosaic.version = 11 : i64} {
  func.func @_fused_conv_kernel(%arg0: i32, %arg1: i32, %arg2: memref<3x3xf32, #tpu.memory_space<smem>>, %arg3: memref<3xf32, #tpu.memory_space<smem>>, %arg4: memref<1x3x16xf32, #tpu.memory_space<vmem>>, %arg5: memref<1x3x16xf32, #tpu.memory_space<vmem>>) attributes {dimension_semantics = [#tpu.dimension_semantics<parallel>, #tpu.dimension_semantics<parallel>], iteration_bounds = array<i64: 2, 1>, scalar_prefetch = 0 : i64, scratch_operands = 0 : i64, tpu.core_type = #tpu.core_type<tc>, window_params = [{transform_indices = @transform_0, window_bounds = array<i64: 3, 3>}, {transform_indices = @transform_1, window_bounds = array<i64: 3>}, {transform_indices = @transform_2, window_bounds = array<i64: 1, 3, 16>}, {transform_indices = @transform_3, window_bounds = array<i64: 1, 3, 16>}]} {
    %c0 = arith.constant 0 : index
    %c0_0 = arith.constant 0 : index
    %c0_1 = arith.constant 0 : index
    %0 = vector.load %arg4[%c0, %c0_0, %c0_1] : memref<1x3x16xf32, #tpu.memory_space<vmem>>, vector<1x1x16xf32>
    %1 = vector.shape_cast %0 : vector<1x1x16xf32> to vector<1x16xf32>
    %c0_2 = arith.constant 0 : index
    %c1 = arith.constant 1 : index
    %c0_3 = arith.constant 0 : index
    %2 = vector.load %arg4[%c0_2, %c1, %c0_3] : memref<1x3x16xf32, #tpu.memory_space<vmem>>, vector<1x1x16xf32>
    %3 = vector.shape_cast %2 : vector<1x1x16xf32> to vector<1x16xf32>
    %c0_4 = arith.constant 0 : index
    %c2 = arith.constant 2 : index
    %c0_5 = arith.constant 0 : index
    %4 = vector.load %arg4[%c0_4, %c2, %c0_5] : memref<1x3x16xf32, #tpu.memory_space<vmem>>, vector<1x1x16xf32>
    %5 = vector.shape_cast %4 : vector<1x1x16xf32> to vector<1x16xf32>
    %c0_6 = arith.constant 0 : index
    %c0_7 = arith.constant 0 : index
    %6 = memref.load %arg2[%c0_6, %c0_7] : memref<3x3xf32, #tpu.memory_space<smem>>
    %7 = vector.broadcast %6 : f32 to vector<1x16xf32>
    %8 = arith.mulf %7, %1 : vector<1x16xf32>
    %c0_8 = arith.constant 0 : index
    %c1_9 = arith.constant 1 : index
    %9 = memref.load %arg2[%c0_8, %c1_9] : memref<3x3xf32, #tpu.memory_space<smem>>
    %10 = vector.broadcast %9 : f32 to vector<1x16xf32>
    %11 = arith.mulf %10, %3 : vector<1x16xf32>
    %12 = arith.addf %8, %11 : vector<1x16xf32>
    %c0_10 = arith.constant 0 : index
    %c2_11 = arith.constant 2 : index
    %13 = memref.load %arg2[%c0_10, %c2_11] : memref<3x3xf32, #tpu.memory_space<smem>>
    %14 = vector.broadcast %13 : f32 to vector<1x16xf32>
    %15 = arith.mulf %14, %5 : vector<1x16xf32>
    %16 = arith.addf %12, %15 : vector<1x16xf32>
    %c0_12 = arith.constant 0 : index
    %17 = memref.load %arg3[%c0_12] : memref<3xf32, #tpu.memory_space<smem>>
    %18 = vector.broadcast %17 : f32 to vector<1x16xf32>
    %19 = arith.addf %16, %18 : vector<1x16xf32>
    %c0_13 = arith.constant 0 : index
    %c0_14 = arith.constant 0 : index
    %c0_15 = arith.constant 0 : index
    %20 = vector.load %arg5[%c0_13, %c0_14, %c0_15] : memref<1x3x16xf32, #tpu.memory_space<vmem>>, vector<1x1x16xf32>
    %21 = vector.shape_cast %20 : vector<1x1x16xf32> to vector<1x16xf32>
    %22 = vector.shape_cast %19 : vector<1x16xf32> to vector<1x1x16xf32>
    tpu.vector_store %arg5[%c0_13, %c0_14, %c0_15], %22 {strides = array<i32>} : memref<1x3x16xf32, #tpu.memory_space<vmem>>, vector<1x1x16xf32>,
    %c1_16 = arith.constant 1 : index
    %c0_17 = arith.constant 0 : index
    %23 = memref.load %arg2[%c1_16, %c0_17] : memref<3x3xf32, #tpu.memory_space<smem>>
    %24 = vector.broadcast %23 : f32 to vector<1x16xf32>
    %25 = arith.mulf %24, %1 : vector<1x16xf32>
    %c1_18 = arith.constant 1 : index
    %c1_19 = arith.constant 1 : index
    %26 = memref.load %arg2[%c1_18, %c1_19] : memref<3x3xf32, #tpu.memory_space<smem>>
    %27 = vector.broadcast %26 : f32 to vector<1x16xf32>
    %28 = arith.mulf %27, %3 : vector<1x16xf32>
    %29 = arith.addf %25, %28 : vector<1x16xf32>
    %c1_20 = arith.constant 1 : index
    %c2_21 = arith.constant 2 : index
    %30 = memref.load %arg2[%c1_20, %c2_21] : memref<3x3xf32, #tpu.memory_space<smem>>
    %31 = vector.broadcast %30 : f32 to vector<1x16xf32>
    %32 = arith.mulf %31, %5 : vector<1x16xf32>
    %33 = arith.addf %29, %32 : vector<1x16xf32>
    %c1_22 = arith.constant 1 : index
    %34 = memref.load %arg3[%c1_22] : memref<3xf32, #tpu.memory_space<smem>>
    %35 = vector.broadcast %34 : f32 to vector<1x16xf32>
    %36 = arith.addf %33, %35 : vector<1x16xf32>
    %c0_23 = arith.constant 0 : index
    %c1_24 = arith.constant 1 : index
    %c0_25 = arith.constant 0 : index
    %37 = vector.load %arg5[%c0_23, %c1_24, %c0_25] : memref<1x3x16xf32, #tpu.memory_space<vmem>>, vector<1x1x16xf32>
    %38 = vector.shape_cast %37 : vector<1x1x16xf32> to vector<1x16xf32>
    %39 = vector.shape_cast %36 : vector<1x16xf32> to vector<1x1x16xf32>
    tpu.vector_store %arg5[%c0_23, %c1_24, %c0_25], %39 {strides = array<i32>} : memref<1x3x16xf32, #tpu.memory_space<vmem>>, vector<1x1x16xf32>,
    %c2_26 = arith.constant 2 : index
    %c0_27 = arith.constant 0 : index
    %40 = memref.load %arg2[%c2_26, %c0_27] : memref<3x3xf32, #tpu.memory_space<smem>>
    %41 = vector.broadcast %40 : f32 to vector<1x16xf32>
    %42 = arith.mulf %41, %1 : vector<1x16xf32>
    %c2_28 = arith.constant 2 : index
    %c1_29 = arith.constant 1 : index
    %43 = memref.load %arg2[%c2_28, %c1_29] : memref<3x3xf32, #tpu.memory_space<smem>>
    %44 = vector.broadcast %43 : f32 to vector<1x16xf32>
    %45 = arith.mulf %44, %3 : vector<1x16xf32>
    %46 = arith.addf %42, %45 : vector<1x16xf32>
    %c2_30 = arith.constant 2 : index
    %c2_31 = arith.constant 2 : index
    %47 = memref.load %arg2[%c2_30, %c2_31] : memref<3x3xf32, #tpu.memory_space<smem>>
    %48 = vector.broadcast %47 : f32 to vector<1x16xf32>
    %49 = arith.mulf %48, %5 : vector<1x16xf32>
    %50 = arith.addf %46, %49 : vector<1x16xf32>
    %c2_32 = arith.constant 2 : index
    %51 = memref.load %arg3[%c2_32] : memref<3xf32, #tpu.memory_space<smem>>
    %52 = vector.broadcast %51 : f32 to vector<1x16xf32>
    %53 = arith.addf %50, %52 : vector<1x16xf32>
    %c0_33 = arith.constant 0 : index
    %c2_34 = arith.constant 2 : index
    %c0_35 = arith.constant 0 : index
    %54 = vector.load %arg5[%c0_33, %c2_34, %c0_35] : memref<1x3x16xf32, #tpu.memory_space<vmem>>, vector<1x1x16xf32>
    %55 = vector.shape_cast %54 : vector<1x1x16xf32> to vector<1x16xf32>
    %56 = vector.shape_cast %53 : vector<1x16xf32> to vector<1x1x16xf32>
    tpu.vector_store %arg5[%c0_33, %c2_34, %c0_35], %56 {strides = array<i32>} : memref<1x3x16xf32, #tpu.memory_space<vmem>>, vector<1x1x16xf32>,
    return
  }
  func.func @transform_0(%arg0: i32, %arg1: i32) -> (i32, i32) {
    %c0_i32 = arith.constant 0 : i32
    %c0_i32_0 = arith.constant 0 : i32
    %c0_i32_1 = arith.constant 0 : i32
    return %c0_i32, %c0_i32_0 : i32, i32
  }
  func.func @transform_1(%arg0: i32, %arg1: i32) -> i32 {
    %c0_i32 = arith.constant 0 : i32
    %c0_i32_0 = arith.constant 0 : i32
    return %c0_i32 : i32
  }
  func.func @transform_2(%arg0: i32, %arg1: i32) -> (i32, i32, i32) {
    %c0_i32 = arith.constant 0 : i32
    %c0_i32_0 = arith.constant 0 : i32
    return %arg0, %c0_i32, %arg1 : i32, i32, i32
  }
  func.func @transform_3(%arg0: i32, %arg1: i32) -> (i32, i32, i32) {
    %c0_i32 = arith.constant 0 : i32
    %c0_i32_0 = arith.constant 0 : i32
    return %arg0, %c0_i32, %arg1 : i32, i32, i32
  }
}

</mosaic_0001>

<bundles_post_ra>
// kernel: tpu_custom_call.1
= control target key start
LH: loop header
LB: loop body
LE: loop exit
PB: predicated region body
PF: predicated region fallthrough
CT: control target
= control target key end

     0   :  { %8 = vsyncpa [#allocation3], 0  ;;  %s607_s0 = inlined_call_operand.vmem [shape: f32[3,3], index: 0, kind: input, shape index: {}]   ;;  %s608_s1 = inlined_call_operand.vmem [shape: f32[3], index: 1, kind: input, shape index: {}]   ;;  %s609_s2 = inlined_call_operand.vmem [shape: f32[2,3,16], index: 2, kind: input, shape index: {}]   ;;  %s610_s3 = inlined_call_operand.vmem [shape: f32[2,3,16], index: 3, kind: output, shape index: {}]  }
   0x1   :  { %9 = vsyncpa [#allocation5], 0  ;;  %s522_s12 = smov 0   ;;  %s524_s13 = smov 0  }
   0x2   :  { %s526_s14 = smov 0  }
   0x3 LB: > { %s370_s15 = sadd.s32 4294967295, %s498_s14   ;;  %s27_s16 = sadd.s32 1, %s494_s13  ;;  %s498_s14 = sphi %s526_s14, %s15_s14   ;;  %s494_s13 = sphi %s524_s13, %s620_s13   ;;  %s490_s12 = sphi %s522_s12, %s619_s12  }
   0x4   : > { %p29_p0 = scmp.ge.s32.totalorder %s27_s16, 2  ;;  %p372_p1 = scmp.ge.s32.totalorder %s498_s14, 1 }
   0x5   : > { %p130_p2 = scmp.lt.s32.totalorder %s498_s14, 3  ;;  %p547_p4 = scmp.eq.s32.totalorder %s370_s15, 0 }
   0x6   : > { %s622_s16 = smov (%p29_p0, %s27_s16), 0  ;;  %s143_s21 = sshll.u32 %s607_s0, 4  ;;  %s144_s21 = int_to_ptr.vmem [resolvable:$true] %s143_s21 }
   0x7   : > { %p543_p3 = pnand %p372_p1, %p130_p2  ;;  %s154_s24 = sshll.u32 %s608_s1, 4  ;;  %s155_s24 = int_to_ptr.vmem [resolvable:$true] %s154_s24 }
   0x8   : > { %s615_s18 = scalar_select %p547_p4, 1, 0 }
   0x9   : > { %s614_s17 = scalar_select %p543_p3, 1, 0 }
   0xa   : > { %p401_p5 = pneg %p543_p3  ;;  %s438_s26 = scalar_lea.vmem %s144_s21, 64 }
   0xb   : > { %p439_p7 = scmp.ne.s32.totalorder %s144_s21, %s438_s26  ;;  %p446_p11 = scmp.lt.s32.totalorder %s144_s21, %s144_s21 }
   0xc   : > { %p561_p6 = pnand %p547_p4, %p401_p5  ;;  %p447_p12 = scmp.lt.s32.totalorder %s438_s26, %s438_s26 }
   0xe   : > { %p440_p8 = pneg %p561_p6  ;;  %p448_p13 = por %p447_p12, %p446_p11 }
  0x10   : > { %p441_p9 = pnand %p440_p8, %p439_p7 }
  0x12   : > { %p442_p10 = pneg %p441_p9 }
  0x14   : > { %p449_p0 = pnand %p448_p13, %p442_p10 }
  0x16   : > { %452 = shalt.err (!%p449_p0)
}
  0x17   : > { %s500_s27 = smov [#allocation2]   ;;  %s453_s28 = scalar_lea.vmem %s155_s24, 16 }
  0x18   : > { %404 = dma.vmem_to_smem (!%p561_p6), %s144_s21, 64, %s500_s27, [#allocation3]  }
  0x19   : > { %p454_p1 = scmp.ne.s32.totalorder %s155_s24, %s453_s28  ;;  %p461_p4 = scmp.lt.s32.totalorder %s155_s24, %s155_s24 }
  0x1a   : > { %p462_p3 = scmp.lt.s32.totalorder %s453_s28, %s453_s28 }
  0x1b   : > { %p456_p2 = pnand %p454_p1, %p440_p8 }
  0x1c   : > { %p463_p7 = por %p462_p3, %p461_p4 }
  0x1d   : > { %p457_p5 = pneg %p456_p2 }
  0x1f   : > { %p464_p9 = pnand %p463_p7, %p457_p5 }
  0x21   : > { %467 = shalt.err (!%p464_p9)
}
  0x22   : > { %s501_s29 = smov [#allocation4]   ;;  %p617_p10 = scmp.ne.s32.totalorder %s614_s17, 0 }
  0x23   : > { %407 = dma.vmem_to_smem (!%p561_p6), %s155_s24, 16, %s501_s29, [#allocation5]  }
  0x24   : > { %177 = sbr.rel (%p617_p10) target bundleno = 70 (0x46), region = 32  ;;  %p618_p11 = scmp.ne.s32.totalorder (!%p617_p10), %s615_s18, 0 }
  0x2b   : > { %481 = dma.done.wait (%p618_p11), [#allocation3], 64  }
  0x2c   : > { %483 = vsyncadd (%p618_p11), [#allocation3], 4294967232 }
  0x2d   : > { %485 = dma.done.wait (%p618_p11), [#allocation5], 16  }
  0x2e   : > { %487 = vsyncadd (%p618_p11), [#allocation5], 4294967280 }
  0x2f   : > { %187 = sfence }
  0x30   : > { %p210_p3 = scmp.lt.s32.totalorder %s490_s12, 1  ;;  %s227_s30 = sld [smem:[#allocation2]]  ;;  %vm241_vm0 = vcmask 122880  }
  0x31   : > { %s381_s4 = sld [smem:[#allocation2 + $0x1]]  ;;  %s382_s5 = sld [smem:[#allocation2 + $0x2]] }
  0x32   : > { %s624_s12 = smov (!%p210_p3, %s490_s12), 1  ;;  %s585_s6 = sld [smem:[#allocation4]] }
  0x33   : > { %s383_s7 = sld [smem:[#allocation2 + $0x80]]  ;;  %s379_s8 = sshll.u32 %s624_s12, 2 }
  0x34   : > { %s384_s9 = sld [smem:[#allocation2 + $0x81]]  ;;  %s216_s15 = scalar_lea.vmem %s609_s2, %s379_s8 }
  0x35   : > { %v224_v0 = vld [vmem:[%s216_s15] sm:$0x1]  ;;  %v225_v1 = vld [vmem:[%s216_s15 + $0x1] sm:$0x1]  ;;  %v226_v2 = vld [vmem:[%s216_s15 + $0x2] sm:$0x1]  ;;  %s223_s24 = scalar_lea.vmem %s610_s3, %s379_s8 }
  0x36   : > { %v228_v3 = vstv %s227_s30  ;;  %s387_s17 = sld [smem:[#allocation2 + $0x100]]  ;;  %s388_s18 = sld [smem:[#allocation2 + $0x101]] }
  0x37   : > { %v229_v4 = vmul.f32 %v228_v3, %v224_v0  ;;  %v231_v5 = vstv %s381_s4  ;;  %v235_v6 = vstv %s382_s5  ;;  %s385_s19 = sld [smem:[#allocation2 + $0x82]]  ;;  %s386_s20 = sld [smem:[#allocation4 + $0x1]] }
  0x38   : > { %v232_v7 = vmul.f32 %v231_v5, %v225_v1  ;;  %v236_v8 = vmul.f32 %v235_v6, %v226_v2  ;;  %s389_s12 = sld [smem:[#allocation2 + $0x102]]  ;;  %v239_v13 = vstv %s585_s6 }
  0x39   : > { %v244_v9 = vstv %s383_s7  ;;  %s390_s21 = sld [smem:[#allocation4 + $0x2]] }
  0x3a   : > { %v233_v10 = vadd.f32 %v232_v7, %v229_v4  ;;  %v245_v11 = vmul.f32 %v244_v9, %v224_v0  ;;  %v247_v12 = vstv %s384_s9 }
  0x3b   : > { %v248_v14 = vmul.f32 %v247_v12, %v225_v1 }
  0x3c   : > { %v237_v15 = vadd.f32 %v236_v8, %v233_v10  ;;  %v259_v16 = vstv %s387_s17  ;;  %v262_v17 = vstv %s388_s18 }
  0x3d   : > { %v249_v18 = vadd.f32 %v248_v14, %v245_v11  ;;  %v260_v20 = vmul.f32 %v259_v16, %v224_v0  ;;  %v263_v21 = vmul.f32 %v262_v17, %v225_v1  ;;  %v251_v22 = vstv %s385_s19 }
  0x3e   : > { %v240_v19 = vadd.f32 %v239_v13, %v237_v15  ;;  %v252_v23 = vmul.f32 %v251_v22, %v226_v2  ;;  %v266_v24 = vstv %s389_s12  ;;  %v255_v25 = vstv %s386_s20 }
  0x3f   : > { %v264_v26 = vadd.f32 %v263_v21, %v260_v20  ;;  %v267_v27 = vmul.f32 %v266_v24, %v226_v2  ;;  %v270_v29 = vstv %s390_s21 }
  0x40   : > { %242 = vst.msk [vmem:[%s223_s24] sm:$0x1] %vm241_vm0, %v240_v19  ;;  %v253_v28 = vadd.f32 %v252_v23, %v249_v18 }
  0x41   : > { %v268_v30 = vadd.f32 %v267_v27, %v264_v26 }
  0x42   : > { %v256_v31 = vadd.f32 %v255_v25, %v253_v28 }
  0x43   : > { %v271_v32 = vadd.f32 %v270_v29, %v268_v30 }
  0x44   : > { %257 = vst.msk [vmem:[%s223_s24 + $0x1] sm:$0x1] %vm241_vm0, %v256_v31 }
  0x45   : > { %272 = vst.msk [vmem:[%s223_s24 + $0x2] sm:$0x1] %vm241_vm0, %v271_v32 }
  0x46 PF: > { %s15_s14 = sadd.s32 1, %s498_s14   ;;  %s619_s12 = smov %s494_s13 }
  0x47   : > { %p12_p4 = scmp.ge.s32.totalorder %s15_s14, 4   ;;  %s620_s13 = smov %s622_s16 }
  0x49   :  { %14 = sbr.rel (!%p12_p4) target bundleno = 3 (0x3), region = 71 }
  0x50   :  { %298 = vsyncpa [#allocation3], 1 }
  0x51   :  { %300 = vsyncpa [#allocation3 + $0x1], 1 }
  0x52   :  { %301 = vsyncpa [#allocation5], 1 }

</bundles_post_ra>
